<compile_context>
chip_gen: v5e
topology: v5e:2x2
jax: 0.10.0
libtpu: 0.0.40
codegen_flags: <defaults>
</compile_context>

<pallas_src>
import functools

import jax
import jax.numpy as jnp
from jax import lax
from jax.experimental import pallas as pl
from jax.experimental.pallas import tpu as pltpu


def _round_up(x: int, m: int) -> int:
    return ((x + m - 1) // m) * m


def _choose_tile(n: int, d: int, itemsize: int, *, target_bytes: int = 6 << 20,
                 max_tile: int = 4096) -> int:
    """Adaptive token-tile size (multiple of 128)."""
    per_row = max(d * itemsize, 1)
    t = (target_bytes // per_row) // 128 * 128
    t = max(128, min(max_tile, int(t)))
    n128 = _round_up(n, 128)
    t = min(t, n128)
    # Guarantee >= 2 grid steps when there is enough work (v7x: 2 TCs/chip).
    if n128 >= 2 * 128:
        t = min(t, _round_up(-(-n128 // 2), 128))
    return t


def _gating_kernel(x_ref, w_ref, o_ref, *, top_n: int, expert_major: bool):
    """Fused gating: matmul -> exact top-k mask -> softmax.

    x_ref : (TILE_N, D)  token tile (pipelined)
    w_ref : (E, D)       gating weight (VMEM resident)
    o_ref : (E, TILE_N)  if expert_major else (TILE_N, E)
    """
    if expert_major:
        # logits^T (E, TILE_N) = W . x^T : A.B^T contraction (q.k^T form),
        # both operands keep D on the lane axis -> no data transpose in-kernel.
        logits = lax.dot_general(
            w_ref[...], x_ref[...],
            dimension_numbers=(((1,), (1,)), ((), ())),
            preferred_element_type=jnp.float32)
        ax = 0
    else:
        # logits (TILE_N, E) = x . W^T : same transpose-free contraction.
        logits = lax.dot_general(
            x_ref[...], w_ref[...],
            dimension_numbers=(((1,), (1,)), ((), ())),
            preferred_element_type=jnp.float32)
        ax = 1

    e = logits.shape[ax]
    k = min(max(int(top_n), 1), e)

    # Exact, count-limited top-k (first-index tie break, like torch.topk):
    # iteratively select the arg-max over the expert axis, record it in a keep
    # mask, suppress it, repeat.  k is tiny & static -> fully unrolled.
    idx = lax.broadcasted_iota(jnp.int32, logits.shape, ax)
    work = logits
    keep = jnp.zeros(logits.shape, dtype=jnp.bool_)
    row_max = None
    for step in range(k):
        cur = jnp.max(work, axis=ax, keepdims=True)
        if step == 0:
            row_max = cur                      # top-1 value == softmax row max
        eq = work == cur
        sel_idx = jnp.min(jnp.where(eq, idx, e), axis=ax, keepdims=True)
        sel = eq & (idx == sel_idx)            # exactly one expert per token
        keep = jnp.logical_or(keep, sel)
        work = jnp.where(sel, -jnp.inf, work)

    # Scatter kept logits into a full(-10000.0) tensor, softmax over experts.
    masked = jnp.where(keep, logits, jnp.float32(-10000.0))
    ex = jnp.exp(masked - row_max)
    denom = jnp.sum(ex, axis=ax, keepdims=True)
    probs = ex / denom                         # exact normalization -> rows sum to 1
    o_ref[...] = probs.astype(o_ref.dtype)


def sparse_gating_forward(x, weight, top_n: int):
    """x: (num_groups, tokens_per_group, dim); weight: (num_moe, dim).

    Returns probs: (num_groups, tokens_per_group, num_moe) in x.dtype.
    """
    g, t, d = x.shape
    e, dw = weight.shape
    assert dw == d, (dw, d)

    n = g * t
    x2d = x.reshape(n, d)
    weight = weight.astype(x.dtype)            # one native dtype feeding the MXU
    itemsize = jnp.dtype(x.dtype).itemsize

    tile = _choose_tile(n, d, itemsize)
    n_pad = _round_up(n, tile)
    if n_pad != n:
        x2d = jnp.pad(x2d, ((0, n_pad - n), (0, 0)))
    grid = (n_pad // tile,)

    # Resident weight: constant index_map.  Single-buffer only when the
    # reclaimed VMEM is meaningful (large E*D); default double-buffer otherwise.
    w_kwargs = {}
    if e * d * itemsize >= (1 << 20):
        w_kwargs["pipeline_mode"] = pl.Buffered(1)
    w_spec = pl.BlockSpec((e, d), lambda i: (0, 0), **w_kwargs)
    x_spec = pl.BlockSpec((tile, d), lambda i: (i, 0))

    expert_major = e < 128
    if expert_major:
        out_shape = jax.ShapeDtypeStruct((e, n_pad), x.dtype)
        out_spec = pl.BlockSpec((e, tile), lambda i: (0, i))
    else:
        out_shape = jax.ShapeDtypeStruct((n_pad, e), x.dtype)
        out_spec = pl.BlockSpec((tile, e), lambda i: (i, 0))

    # Explicit VMEM limit from the actual footprint (double-buffered x/output,
    # weight per its buffering) with headroom; capped well under v7x physical.
    w_bufs = 1 if "pipeline_mode" in w_kwargs else 2
    footprint = (2 * tile * d * itemsize
                 + w_bufs * e * d * itemsize
                 + 2 * e * tile * itemsize)
    vmem_limit = int(min(max(2 * footprint + (2 << 20), 16 << 20), 48 << 20))

    cost = pl.CostEstimate(
        flops=2 * n_pad * d * e,
        transcendentals=n_pad * e,
        bytes_accessed=(n_pad * d * itemsize + e * d * itemsize
                        + n_pad * e * itemsize),
    )

    probs = pl.pallas_call(
        functools.partial(_gating_kernel, top_n=top_n, expert_major=expert_major),
        out_shape=out_shape,
        grid=grid,
        in_specs=[x_spec, w_spec],
        out_specs=out_spec,
        compiler_params=pltpu.CompilerParams(
            dimension_semantics=("parallel",),
            vmem_limit_bytes=vmem_limit,
        ),
        cost_estimate=cost,
    )(x2d, weight)

    if expert_major:
        # One wrapper-side transpose back to token-major (layout plumbing only;
        # only taken for small expert counts where the lane-dense store wins).
        return probs[:, :n].T.reshape(g, t, e)
    return probs[:n].reshape(g, t, e)


def _reference_forward(x, weight, top_n: int):
    """Pure-JAX reference (matches the PyTorch module semantics)."""
    logits = jnp.einsum("gtd,ed->gte", x, weight).astype(jnp.float32)
    topv, topi = lax.top_k(logits, top_n)
    onehot = jax.nn.one_hot(topi, logits.shape[-1], dtype=logits.dtype)  # (g,t,k,e)
    scat = jnp.einsum("gtke,gtk->gte", onehot, topv)
    keep = jnp.sum(onehot, axis=2) > 0
    masked = jnp.where(keep, scat, jnp.full_like(logits, -10000.0))
    return jax.nn.softmax(masked, axis=-1)


if __name__ == "__main__":
    # Module hyper-params (synthetic, deterministic init)
    dim = 32
    num_moe = 8
    top_n = 2

    # Input implied by forward: 3-D (num_groups, tokens_per_group, dim)
    num_groups = 2
    tokens_per_group = 8

    key = jax.random.PRNGKey(0)
    kx, kw = jax.random.split(key)
    x = jax.random.normal(kx, (num_groups, tokens_per_group, dim), dtype=jnp.float32)
    # nn.Linear(dim, num_moe, bias=False) weight: (num_moe, dim)
    bound = 1.0 / (dim ** 0.5)
    weight = jax.random.uniform(
        kw, (num_moe, dim), minval=-bound, maxval=bound, dtype=jnp.float32
    )

    probs = jax.block_until_ready(sparse_gating_forward(x, weight, top_n))

    # Sanity checks against the pure-JAX reference.
    ref = _reference_forward(x, weight, top_n)
    assert probs.shape == (num_groups, tokens_per_group, num_moe)
    err = float(jnp.max(jnp.abs(probs.astype(jnp.float32) - ref)))
    assert err < 1e-4, err
    row_sum_err = float(
        jnp.max(jnp.abs(jnp.sum(probs.astype(jnp.float32), axis=-1) - 1.0))
    )
    assert row_sum_err < 1e-4, row_sum_err

    print("KERNEL_OK")
</pallas_src>

<mosaic_0001>
module attributes {stable_mosaic.version = 11 : i64} {
  func.func @_gating_kernel(%arg0: i32, %arg1: memref<128x32xf32, #tpu.memory_space<vmem>>, %arg2: memref<8x32xf32, #tpu.memory_space<vmem>>, %arg3: memref<8x128xf32, #tpu.memory_space<vmem>>) attributes {dimension_semantics = [#tpu.dimension_semantics<parallel>], iteration_bounds = array<i64: 1>, scalar_prefetch = 0 : i64, scratch_operands = 0 : i64, tpu.core_type = #tpu.core_type<tc>, window_params = [{transform_indices = @transform_0, window_bounds = array<i64: 128, 32>}, {pipeline_mode = #tpu.pipeline_mode<synchronous>, transform_indices = @transform_1, window_bounds = array<i64: 8, 32>}, {transform_indices = @transform_2, window_bounds = array<i64: 8, 128>}]} {
    %c0 = arith.constant 0 : index
    %c0_0 = arith.constant 0 : index
    %0 = vector.load %arg2[%c0, %c0_0] : memref<8x32xf32, #tpu.memory_space<vmem>>, vector<8x32xf32>
    %c0_1 = arith.constant 0 : index
    %c0_2 = arith.constant 0 : index
    %1 = vector.load %arg1[%c0_1, %c0_2] : memref<128x32xf32, #tpu.memory_space<vmem>>, vector<128x32xf32>
    %cst = arith.constant dense<0.000000e+00> : vector<8x128xf32>
    %2 = tpu.matmul %0, %1, %cst {dimension_numbers = #tpu.dot_dimension_numbers<[1], [1], [0], [0], [0, 0, 1, 0], [], []>} : vector<8x32xf32>, vector<128x32xf32>, vector<8x128xf32> -> vector<8x128xf32>
    %3 = tpu.iota {dimensions = array<i32: 0>} : vector<8x128xi32>
    %false = arith.constant false
    %4 = vector.broadcast %false : i1 to vector<8x128xi1>
    %cst_3 = arith.constant dense<0xFF800000> : vector<128xf32>
    %5 = vector.multi_reduction <maximumf>, %2, %cst_3 [0] : vector<8x128xf32> to vector<128xf32>
    %6 = vector.shape_cast %5 : vector<128xf32> to vector<1x128xf32>
    %7 = vector.broadcast %6 : vector<1x128xf32> to vector<8x128xf32>
    %8 = arith.cmpf oeq, %2, %7 : vector<8x128xf32>
    %c8_i32 = arith.constant 8 : i32
    %9 = vector.broadcast %c8_i32 : i32 to vector<8x128xi32>
    %10 = arith.select %8, %3, %9 : vector<8x128xi1>, vector<8x128xi32>
    %cst_4 = arith.constant dense<2147483647> : vector<128xi32>
    %11 = vector.multi_reduction <minsi>, %10, %cst_4 [0] : vector<8x128xi32> to vector<128xi32>
    %12 = vector.shape_cast %11 : vector<128xi32> to vector<1x128xi32>
    %13 = vector.broadcast %12 : vector<1x128xi32> to vector<8x128xi32>
    %14 = arith.cmpi eq, %3, %13 : vector<8x128xi32>
    %15 = arith.andi %8, %14 : vector<8x128xi1>
    %16 = arith.ori %4, %15 : vector<8x128xi1>
    %cst_5 = arith.constant 0xFF800000 : f32
    %17 = vector.broadcast %cst_5 : f32 to vector<8x128xf32>
    %18 = arith.select %15, %17, %2 : vector<8x128xi1>, vector<8x128xf32>
    %cst_6 = arith.constant dense<0xFF800000> : vector<128xf32>
    %19 = vector.multi_reduction <maximumf>, %18, %cst_6 [0] : vector<8x128xf32> to vector<128xf32>
    %20 = vector.shape_cast %19 : vector<128xf32> to vector<1x128xf32>
    %21 = vector.broadcast %20 : vector<1x128xf32> to vector<8x128xf32>
    %22 = arith.cmpf oeq, %18, %21 : vector<8x128xf32>
    %c8_i32_7 = arith.constant 8 : i32
    %23 = vector.broadcast %c8_i32_7 : i32 to vector<8x128xi32>
    %24 = arith.select %22, %3, %23 : vector<8x128xi1>, vector<8x128xi32>
    %cst_8 = arith.constant dense<2147483647> : vector<128xi32>
    %25 = vector.multi_reduction <minsi>, %24, %cst_8 [0] : vector<8x128xi32> to vector<128xi32>
    %26 = vector.shape_cast %25 : vector<128xi32> to vector<1x128xi32>
    %27 = vector.broadcast %26 : vector<1x128xi32> to vector<8x128xi32>
    %28 = arith.cmpi eq, %3, %27 : vector<8x128xi32>
    %29 = arith.andi %22, %28 : vector<8x128xi1>
    %30 = arith.ori %16, %29 : vector<8x128xi1>
    %cst_9 = arith.constant -1.000000e+04 : f32
    %31 = vector.broadcast %cst_9 : f32 to vector<8x128xf32>
    %32 = arith.select %30, %2, %31 : vector<8x128xi1>, vector<8x128xf32>
    %33 = vector.broadcast %6 : vector<1x128xf32> to vector<8x128xf32>
    %34 = arith.subf %32, %33 : vector<8x128xf32>
    %35 = math.exp %34 : vector<8x128xf32>
    %cst_10 = arith.constant dense<0.000000e+00> : vector<128xf32>
    %36 = vector.multi_reduction <add>, %35, %cst_10 [0] : vector<8x128xf32> to vector<128xf32>
    %37 = vector.shape_cast %36 : vector<128xf32> to vector<1x128xf32>
    %38 = vector.broadcast %37 : vector<1x128xf32> to vector<8x128xf32>
    %39 = arith.divf %35, %38 : vector<8x128xf32>
    %c0_11 = arith.constant 0 : index
    %c0_12 = arith.constant 0 : index
    %40 = vector.load %arg3[%c0_11, %c0_12] : memref<8x128xf32, #tpu.memory_space<vmem>>, vector<8x128xf32>
    tpu.vector_store %arg3[%c0_11, %c0_12], %39 {strides = array<i32>} : memref<8x128xf32, #tpu.memory_space<vmem>>, vector<8x128xf32>,
    return
  }
  func.func @transform_0(%arg0: i32) -> (i32, i32) {
    %c0_i32 = arith.constant 0 : i32
    %c0_i32_0 = arith.constant 0 : i32
    return %arg0, %c0_i32 : i32, i32
  }
  func.func @transform_1(%arg0: i32) -> (i32, i32) {
    %c0_i32 = arith.constant 0 : i32
    %c0_i32_0 = arith.constant 0 : i32
    %c0_i32_1 = arith.constant 0 : i32
    return %c0_i32, %c0_i32_0 : i32, i32
  }
  func.func @transform_2(%arg0: i32) -> (i32, i32) {
    %c0_i32 = arith.constant 0 : i32
    %c0_i32_0 = arith.constant 0 : i32
    return %c0_i32, %arg0 : i32, i32
  }
}

</mosaic_0001>

<bundles_post_ra>
// kernel: tpu_custom_call.1
= control target key start
LH: loop header
LB: loop body
LE: loop exit
PB: predicated region body
PF: predicated region fallthrough
CT: control target
= control target key end

     0   :  { %vm29_vm0 = vcmask 261120   ;;  %s328_s0 = inlined_call_operand.vmem [shape: f32[128,32], index: 0, kind: input, shape index: {}]   ;;  %s329_s1 = inlined_call_operand.vmem [shape: f32[8,32], index: 1, kind: input, shape index: {}]   ;;  %s330_s2 = inlined_call_operand.hbm [shape: f32[8,128], index: 2, kind: output, shape index: {}]  }
   0x1   :  { %v28_v0 = vld [vmem:[%s328_s0 + $0x78] sm:$0xff]  ;;  %v27_v1 = vld [vmem:[%s328_s0 + $0x70] sm:$0xff] }
   0x2   :  { %185 = vmatpush.xpose.msk.msra.mxu0 %vm29_vm0, %v28_v0 }
   0x3   :  { %7 = vsyncpa [#allocation3], 0  ;;  %v26_v2 = vld [vmem:[%s328_s0 + $0x68] sm:$0xff]  ;;  %v25_v3 = vld [vmem:[%s328_s0 + $0x60] sm:$0xff]  ;;  %v101_v21 = vlaneseq  ;;  %s176_s17 = sshll.u32 %s330_s2, 4  ;;  %s177_s17 = int_to_ptr.hbm [resolvable:$true] %s176_s17 }
   0x4   :  { %v24_v4 = vld [vmem:[%s328_s0 + $0x58] sm:$0xff]  ;;  %v23_v5 = vld [vmem:[%s328_s0 + $0x50] sm:$0xff]  ;;  %v22_v6 = vld [vmem:[%s328_s0 + $0x48] sm:$0xff] }
   0x5   :  { %v21_v7 = vld [vmem:[%s328_s0 + $0x40] sm:$0xff]  ;;  %v20_v8 = vld [vmem:[%s328_s0 + $0x38] sm:$0xff]  ;;  %v19_v9 = vld [vmem:[%s328_s0 + $0x30] sm:$0xff]  ;;  %v102_v24 = vshrl.u32 %v101_v21, 7 }
   0x6   :  { %186 = vmatpush.xpose.msk.msra.mxu0 %vm29_vm0, %v27_v1  ;;  %v18_v10 = vld [vmem:[%s328_s0 + $0x28] sm:$0xff]  ;;  %v17_v11 = vld [vmem:[%s328_s0 + $0x20] sm:$0xff]  ;;  %v16_v12 = vld [vmem:[%s328_s0 + $0x18] sm:$0xff] }
   0x7   :  { %v15_v13 = vld [vmem:[%s328_s0 + $0x10] sm:$0xff]  ;;  %v14_v14 = vld [vmem:[%s328_s0 + $0x8] sm:$0xff]  ;;  %v13_v15 = vld [vmem:[%s328_s0] sm:$0xff]  ;;  %s233_s0 = smov [#allocation2]  }
   0x8   :  { %v12_v16 = vld [vmem:[%s329_s1] sm:$0xff]  ;;  %s174_s1 = sshll.u32 %s233_s0, 4  ;;  %s175_s1 = int_to_ptr.vmem [resolvable:$true] %s174_s1 }
   0xa   :  { %187 = vmatpush.xpose.msk.msra.mxu0 %vm29_vm0, %v26_v2 }
   0xe   :  { %188 = vmatpush.xpose.msk.msra.mxu0 %vm29_vm0, %v25_v3 }
  0x12   :  { %189 = vmatpush.xpose.msk.msra.mxu0 %vm29_vm0, %v24_v4 }
  0x16   :  { %190 = vmatpush.xpose.msk.msra.mxu0 %vm29_vm0, %v23_v5 }
  0x1a   :  { %191 = vmatpush.xpose.msk.msra.mxu0 %vm29_vm0, %v22_v6 }
  0x1e   :  { %192 = vmatpush.xpose.msk.msra.mxu0 %vm29_vm0, %v21_v7 }
  0x22   :  { %193 = vmatpush.xpose.msk.msra.mxu0 %vm29_vm0, %v20_v8 }
  0x26   :  { %194 = vmatpush.xpose.msk.msra.mxu0 %vm29_vm0, %v19_v9 }
  0x2a   :  { %195 = vmatpush.xpose.msk.msra.mxu0 %vm29_vm0, %v18_v10 }
  0x2e   :  { %196 = vmatpush.xpose.msk.msra.mxu0 %vm29_vm0, %v17_v11 }
  0x32   :  { %197 = vmatpush.xpose.msk.msra.mxu0 %vm29_vm0, %v16_v12 }
  0x36   :  { %198 = vmatpush.xpose.msk.msra.mxu0 %vm29_vm0, %v15_v13 }
  0x3a   :  { %199 = vmatpush.xpose.msk.msra.mxu0 %vm29_vm0, %v14_v14 }
  0x3e   :  { %200 = vmatpush.xpose.msk.msra.mxu0 %vm29_vm0, %v13_v15 }
  0x41   :  { %201 = vmatmul.msk.f32.vlgmr.msra.gmra.mxu0 %vm29_vm0, %v12_v16 }
  0xbe   :  { %v98_v17 = vpop.f32.mrf.mxu0 }
  0xbf   :  { %v103_v18 = vrot.slane %v98_v17, 4 }
  0xc1   :  { %v104_v19 = vmax.f32 %v98_v17, %v103_v18 }
  0xc3   :  { %v105_v20 = vrot.slane %v104_v19, 2 }
  0xc5   :  { %v106_v22 = vmax.f32 %v104_v19, %v105_v20 }
  0xc7   :  { %v107_v23 = vrot.slane %v106_v22, 1 }
  0xc9   :  { %v108_v25 = vmax.f32 %v106_v22, %v107_v23 }
  0xcb   :  { %vm109_vm1 = vcmp.eq.f32.partialorder %v98_v17, %v108_v25 }
  0xcc   :  { %v110_v26 = vsel %vm109_vm1, %v102_v24, 8 }
  0xcd   :  { %v111_v27 = vrot.slane %v110_v26, 4 }
  0xcf   :  { %vm112_vm2 = vcmp.lt.s32.totalorder %v110_v26, %v111_v27 }
  0xd0   :  { %v113_v28 = vsel %vm112_vm2, %v110_v26, %v111_v27 }
  0xd1   :  { %v114_v29 = vrot.slane %v113_v28, 2 }
  0xd3   :  { %vm115_vm3 = vcmp.lt.s32.totalorder %v113_v28, %v114_v29 }
  0xd4   :  { %v116_v30 = vsel %vm115_vm3, %v113_v28, %v114_v29 }
  0xd5   :  { %v117_v31 = vrot.slane %v116_v30, 1 }
  0xd7   :  { %vm118_vm4 = vcmp.lt.s32.totalorder %v116_v30, %v117_v31 }
  0xd8   :  { %v119_v32 = vsel %vm118_vm4, %v116_v30, %v117_v31 }
  0xd9   :  { %vm120_vm5 = vcmp.eq.s32.totalorder %v102_v24, %v119_v32 }
  0xda   :  { %vm317_vm6 = vmand %vm109_vm1, %vm120_vm5 }
  0xdb   :  { %v122_v34 = vsel %vm317_vm6, -inf, %v98_v17 }
  0xdc   :  { %v123_v35 = vrot.slane %v122_v34, 4 }
  0xde   :  { %v124_v36 = vmax.f32 %v122_v34, %v123_v35 }
  0xe0   :  { %v125_v37 = vrot.slane %v124_v36, 2 }
  0xe2   :  { %v126_v38 = vmax.f32 %v124_v36, %v125_v37 }
  0xe4   :  { %v127_v39 = vrot.slane %v126_v38, 1 }
  0xe6   :  { %v128_v40 = vmax.f32 %v126_v38, %v127_v39 }
  0xe8   :  { %vm129_vm7 = vcmp.eq.f32.partialorder %v122_v34, %v128_v40 }
  0xe9   :  { %v130_v41 = vsel %vm129_vm7, %v102_v24, 8 }
  0xea   :  { %v131_v42 = vrot.slane %v130_v41, 4 }
  0xec   :  { %vm132_vm8 = vcmp.lt.s32.totalorder %v130_v41, %v131_v42 }
  0xed   :  { %v133_v43 = vsel %vm132_vm8, %v130_v41, %v131_v42 }
  0xee   :  { %v134_v44 = vrot.slane %v133_v43, 2 }
  0xf0   :  { %vm135_vm9 = vcmp.lt.s32.totalorder %v133_v43, %v134_v44 }
  0xf1   :  { %v136_v45 = vsel %vm135_vm9, %v133_v43, %v134_v44 }
  0xf2   :  { %v137_v46 = vrot.slane %v136_v45, 1 }
  0xf4   :  { %vm138_vm10 = vcmp.lt.s32.totalorder %v136_v45, %v137_v46 }
  0xf5   :  { %v139_v47 = vsel %vm138_vm10, %v136_v45, %v137_v46 }
  0xf6   :  { %vm140_vm11 = vcmp.eq.s32.totalorder %v102_v24, %v139_v47 }
  0xf7   :  { %vm141_vm12 = vmand %vm129_vm7, %vm140_vm11 }
  0xf8   :  { %vm142_vm13 = vmor %vm317_vm6, %vm141_vm12 }
  0xf9   :  { %v143_v48 = vsel %vm142_vm13, %v98_v17, -10000.0 }
  0xfa   :  { %v144_v49 = vsub.f32 %v143_v48, %v108_v25 }
  0xfc   :  { %v145_v50 = vmul.f32 1.442695, %v144_v49 }
  0xfe   :  { %203 = vpow2.f32 %v145_v50 }
 0x104   :  { %v204_v51 = vpop.eup %203 }
 0x105   :  { %v147_v52 = vrot.slane %v204_v51, 4 }
 0x107   :  { %v148_v53 = vadd.f32 %v204_v51, %v147_v52 }
 0x109   :  { %v149_v54 = vrot.slane %v148_v53, 2 }
 0x10b   :  { %v150_v55 = vadd.f32 %v149_v54, %v148_v53 }
 0x10d   :  { %v151_v56 = vrot.slane %v150_v55, 1 }
 0x10f   :  { %v152_v57 = vadd.f32 %v151_v56, %v150_v55 }
 0x111   :  { %205 = vrcp.f32 %v152_v57  ;;  %v164_v61 = vand.u32 2147483648, %v152_v57  ;;  %v162_v63 = vand.u32 2147483647, %v152_v57  ;;  %vm158_vm15 = vweird.f32 %v152_v57 }
 0x113   :  { %v165_v1 = vor.u32 1.1754944e-38, %v164_v61  ;;  %vm163_vm1 = vcmp.eq.f32.partialorder %v162_v63, 8.507059e+37 }
 0x117   :  { %v206_v58 = vpop.eup %205 }
 0x118   :  { %v154_v59 = vmul.f32 %v206_v58, %v152_v57  ;;  %vm159_vm14 = vweird.f32 %v206_v58 }
 0x119   :  { %vm160_vm0 = vmor %vm158_vm15, %vm159_vm14 }
 0x11a   :  { %v155_v60 = vsub.f32 1.0, %v154_v59 }
 0x11c   :  { %v156_v62 = vmul.f32 %v206_v58, %v155_v60 }
 0x11e   :  { %v157_v0 = vadd.f32 %v206_v58, %v156_v62 }
 0x120   :  { %v161_v2 = vsel %vm160_vm0, %v206_v58, %v157_v0 }
 0x121   :  { %v166_v3 = vsel %vm163_vm1, %v165_v1, %v161_v2 }
 0x122   :  { %v167_v4 = vmul.f32 %v204_v51, %v166_v3 }
 0x124   :  { %168 = vst [vmem:[#allocation2] sm:$0xff] %v167_v4 }
 0x125   :  { %179 = dma.vmem_to_hbm [thread:$0]  %s175_s1, 128, %s177_s17, [#allocation3]  }
 0x126   :  { %231 = dma.done.wait [#allocation3], 128  }
 0x127   :  { %232 = vsyncadd [#allocation3], 4294967168 }
 0x128   :  { %184 = vsyncpa [#allocation3], 1 }

</bundles_post_ra>
